<compile_context>
chip_gen: v5e
topology: v5e:2x2
jax: 0.10.0
libtpu: 0.0.40
codegen_flags: <defaults>
</compile_context>

<pallas_src>
import functools
import math

import jax
import jax.numpy as jnp
from jax.experimental import pallas as pl
from jax.experimental.pallas import tpu as pltpu


def _merge_ln_kernel(xe_ref, xo_ref, we_ref, wo_ref, g_ref, b_ref, o_ref, *, eps):
    """One row tile of: y = xe@We + xo@Wo ; out = LayerNorm(y) * g + b.

    xe_ref/xo_ref: (tb, 1, Wp2, 2C)  even / odd input-row slabs
    we_ref/wo_ref: (2C, N)           split reduction weights
    g_ref/b_ref  : (1, N)            LayerNorm affine (f32)
    o_ref        : (tb*Wp2, N)
    """
    tb, _, wp2, c2 = xe_ref.shape
    rows = tb * wp2
    xe = xe_ref[...].reshape(rows, c2)
    xo = xo_ref[...].reshape(rows, c2)

    # MXU matmuls, f32 accumulation (works for f32 or bf16 inputs).
    y = jnp.dot(xe, we_ref[...], preferred_element_type=jnp.float32)
    y = y + jnp.dot(xo, wo_ref[...], preferred_element_type=jnp.float32)

    # Single-pass LayerNorm statistics (biased variance, like torch LayerNorm).
    n = y.shape[-1]
    inv_n = 1.0 / n
    mean = jnp.sum(y, axis=-1, keepdims=True) * inv_n
    mean_sq = jnp.sum(y * y, axis=-1, keepdims=True) * inv_n
    var = jnp.maximum(mean_sq - mean * mean, 0.0)
    y_norm = (y - mean) * jax.lax.rsqrt(var + eps)
    out = y_norm * g_ref[...] + b_ref[...]
    o_ref[...] = out.astype(o_ref.dtype)


def _choose_row_tile(rows0, wp2, target_out_rows=512, min_steps=4):
    """Tile size along the (B*Hp/2) axis.

    The output row block is tb*wp2, which must be a multiple of 8 (f32 sublane)
    unless it covers the whole output, so tb is kept a multiple of
    q = 8 / gcd(wp2, 8).  Aim for ~target_out_rows output rows per grid step,
    but keep >= min_steps grid steps (v7x megacore sharding) when possible.
    """
    q = 8 // math.gcd(wp2, 8)
    tb = max(q, (max(1, target_out_rows // max(wp2, 1)) // q) * q)
    tb = min(tb, rows0)
    while tb > q and (rows0 + tb - 1) // tb < min_steps:
        new_tb = max(q, ((tb // 2) // q) * q)
        if new_tb == tb:
            break
        tb = new_tb
    if tb >= rows0:
        tb = rows0
    return tb


@functools.partial(jax.jit, static_argnums=(1, 2))
def _patch_merging_impl(x, H, W, w_reduction, ln_gamma, ln_beta):
    B, L, C = x.shape
    assert L == H * W, "input feature has wrong size"
    dtype = x.dtype
    K4, N = w_reduction.shape
    assert K4 == 4 * C

    x = x.reshape(B, H, W, C)
    pad_h, pad_w = H % 2, W % 2
    if pad_h or pad_w:
        x = jnp.pad(x, ((0, 0), (0, pad_h), (0, pad_w), (0, 0)))
    Hp, Wp = H + pad_h, W + pad_w
    Hp2, Wp2 = Hp // 2, Wp // 2

    rows0 = B * Hp2          # tiled axis: pairs of input rows
    C2 = 2 * C               # per-slab contraction width
    M = rows0 * Wp2          # output rows

    # Pure reshape (no data movement): (B, Hp, Wp, C) -> (B*Hp/2, 2, Wp/2, 2C).
    # Axis 1 is the row parity; the last dim is [even-col chans | odd-col chans].
    xv = x.reshape(rows0, 2, Wp2, C2)

    # Split the (4C, N) reduction weight to match the fused slab layout:
    # parity-0 slab sees [x0 | x2], parity-1 slab sees [x1 | x3].
    w = w_reduction.astype(dtype)
    w_even = jnp.concatenate([w[0:C], w[2 * C:3 * C]], axis=0)      # (2C, N)
    w_odd = jnp.concatenate([w[C:2 * C], w[3 * C:4 * C]], axis=0)   # (2C, N)

    gamma2 = ln_gamma.reshape(1, N).astype(jnp.float32)
    beta2 = ln_beta.reshape(1, N).astype(jnp.float32)

    tb = _choose_row_tile(rows0, Wp2)
    tm_out = tb * Wp2
    grid = (pl.cdiv(rows0, tb),)

    # Explicit VMEM budget (double-buffered tiles + weights + f32 working set).
    isz = jnp.dtype(dtype).itemsize
    est = (2 * 2 * tb * Wp2 * C2 * isz
           + 2 * tm_out * N * isz
           + 2 * 2 * C2 * N * isz
           + 2 * 2 * N * 4
           + 2 * tm_out * N * 4)
    vmem_limit = int(min(64 * 1024 * 1024, max(32 * 1024 * 1024, 2 * est)))

    out2d = pl.pallas_call(
        functools.partial(_merge_ln_kernel, eps=1e-5),
        out_shape=jax.ShapeDtypeStruct((M, N), dtype),
        grid_spec=pltpu.PrefetchScalarGridSpec(
            num_scalar_prefetch=0,
            grid=grid,
            in_specs=[
                # Even / odd input-row slabs (the fused 2x2 gather).
                pl.BlockSpec((tb, 1, Wp2, C2), lambda i: (i, 0, 0, 0)),
                pl.BlockSpec((tb, 1, Wp2, C2), lambda i: (i, 1, 0, 0)),
                # Grid-invariant operands (small; fetched once).
                pl.BlockSpec((C2, N), lambda i: (0, 0)),
                pl.BlockSpec((C2, N), lambda i: (0, 0)),
                pl.BlockSpec((1, N), lambda i: (0, 0)),
                pl.BlockSpec((1, N), lambda i: (0, 0)),
            ],
            out_specs=pl.BlockSpec((tm_out, N), lambda i: (i, 0)),
        ),
        compiler_params=pltpu.CompilerParams(
            dimension_semantics=("parallel",),
            vmem_limit_bytes=vmem_limit,
        ),
    )(xv, xv, w_even, w_odd, gamma2, beta2)

    return out2d.reshape(B, Hp2 * Wp2, N)


def patch_merging(x, H, W, w_reduction, ln_gamma, ln_beta):
    """Mirrors PatchMerging.forward.

    x: (B, H*W, C); w_reduction: (4C, 2C) (torch Linear(4C, 2C, bias=False));
    ln_gamma, ln_beta: (2C,).  Returns (out, Hp//2, Wp//2) with
    out: (B, (Hp//2)*(Wp//2), 2C).
    """
    out = _patch_merging_impl(x, H, W, w_reduction, ln_gamma, ln_beta)
    return out, (H + H % 2) // 2, (W + W % 2) // 2


def _reference(x, H, W, w, gamma, beta, eps=1e-5):
    """Pure-JAX reference of the same forward pass (mirrors the torch module)."""
    B, L, C = x.shape
    x = x.reshape(B, H, W, C)
    if H % 2 or W % 2:
        x = jnp.pad(x, ((0, 0), (0, H % 2), (0, W % 2), (0, 0)))
    x0 = x[:, 0::2, 0::2, :]
    x1 = x[:, 1::2, 0::2, :]
    x2 = x[:, 0::2, 1::2, :]
    x3 = x[:, 1::2, 1::2, :]
    xc = jnp.concatenate([x0, x1, x2, x3], -1).reshape(B, -1, 4 * C)
    y = xc @ w
    mean = jnp.mean(y, -1, keepdims=True)
    var = jnp.mean((y - mean) ** 2, -1, keepdims=True)
    return (y - mean) * jax.lax.rsqrt(var + eps) * gamma + beta


if __name__ == "__main__":
    key = jax.random.PRNGKey(0)

    def make_params(k, C):
        kw, kg, kb = jax.random.split(k, 3)
        w = jax.random.normal(kw, (4 * C, 2 * C), jnp.float32) * 0.05
        g = 1.0 + 0.1 * jax.random.normal(kg, (2 * C,), jnp.float32)
        b = 0.1 * jax.random.normal(kb, (2 * C,), jnp.float32)
        return w, g, b

    # --- Test 1: even spatial dims, f32, lane-dense output (2C = 128). ---
    B, H, W, C = 2, 16, 16, 64
    k1, k2, key = jax.random.split(key, 3)
    x = jax.random.normal(k1, (B, H * W, C), jnp.float32)
    w, g, b = make_params(k2, C)
    out, Hh, Wh = patch_merging(x, H, W, w, g, b)
    out = jax.block_until_ready(out)
    ref = _reference(x, H, W, w, g, b)
    assert out.shape == (B, Hh * Wh, 2 * C)
    assert (Hh, Wh) == (H // 2, W // 2)
    assert jnp.allclose(out, ref, atol=5e-4, rtol=5e-4), "f32 mismatch"

    # --- Test 2: odd spatial dims (padding path) + ragged row grid. ---
    B, H, W, C = 1, 17, 15, 32
    k1, k2, key = jax.random.split(key, 3)
    x = jax.random.normal(k1, (B, H * W, C), jnp.float32)
    w, g, b = make_params(k2, C)
    out, Hh, Wh = patch_merging(x, H, W, w, g, b)
    out = jax.block_until_ready(out)
    ref = _reference(x, H, W, w, g, b)
    assert out.shape == (B, Hh * Wh, 2 * C)
    assert (Hh, Wh) == (9, 8)
    assert jnp.allclose(out, ref, atol=5e-4, rtol=5e-4), "padded/ragged mismatch"

    # --- Test 3: bf16 activations + weights (halved HBM traffic), f32 LN math. ---
    B, H, W, C = 1, 32, 32, 64
    k1, k2, key = jax.random.split(key, 3)
    x = jax.random.normal(k1, (B, H * W, C), jnp.float32)
    w, g, b = make_params(k2, C)
    out_bf, Hh, Wh = patch_merging(
        x.astype(jnp.bfloat16), H, W, w.astype(jnp.bfloat16), g, b)
    out_bf = jax.block_until_ready(out_bf)
    ref_bf = _reference(
        x.astype(jnp.bfloat16).astype(jnp.float32), H, W,
        w.astype(jnp.bfloat16).astype(jnp.float32), g, b)
    assert out_bf.dtype == jnp.bfloat16
    assert out_bf.shape == (B, Hh * Wh, 2 * C)
    assert jnp.allclose(out_bf.astype(jnp.float32), ref_bf, atol=5e-2, rtol=5e-2), \
        "bf16 mismatch"

    print("KERNEL_OK")
</pallas_src>

<mosaic_0001>
module attributes {stable_mosaic.version = 11 : i64} {
  func.func @_merge_ln_kernel(%arg0: i32, %arg1: memref<4x1x8x128xf32, #tpu.memory_space<vmem>>, %arg2: memref<4x1x8x128xf32, #tpu.memory_space<vmem>>, %arg3: memref<128x128xf32, #tpu.memory_space<vmem>>, %arg4: memref<128x128xf32, #tpu.memory_space<vmem>>, %arg5: memref<1x128xf32, #tpu.memory_space<vmem>>, %arg6: memref<1x128xf32, #tpu.memory_space<vmem>>, %arg7: memref<32x128xf32, #tpu.memory_space<vmem>>) attributes {dimension_semantics = [#tpu.dimension_semantics<parallel>], iteration_bounds = array<i64: 4>, scalar_prefetch = 0 : i64, scratch_operands = 0 : i64, tpu.core_type = #tpu.core_type<tc>, window_params = [{transform_indices = @transform_0, window_bounds = array<i64: 4, 1, 8, 128>}, {transform_indices = @transform_1, window_bounds = array<i64: 4, 1, 8, 128>}, {pipeline_mode = #tpu.pipeline_mode<synchronous>, transform_indices = @transform_2, window_bounds = array<i64: 128, 128>}, {pipeline_mode = #tpu.pipeline_mode<synchronous>, transform_indices = @transform_3, window_bounds = array<i64: 128, 128>}, {pipeline_mode = #tpu.pipeline_mode<synchronous>, transform_indices = @transform_4, window_bounds = array<i64: 1, 128>}, {pipeline_mode = #tpu.pipeline_mode<synchronous>, transform_indices = @transform_5, window_bounds = array<i64: 1, 128>}, {transform_indices = @transform_6, window_bounds = array<i64: 32, 128>}]} {
    %c0 = arith.constant 0 : index
    %c0_0 = arith.constant 0 : index
    %c0_1 = arith.constant 0 : index
    %c0_2 = arith.constant 0 : index
    %0 = vector.load %arg1[%c0, %c0_0, %c0_1, %c0_2] : memref<4x1x8x128xf32, #tpu.memory_space<vmem>>, vector<4x1x8x128xf32>
    %1 = vector.shape_cast %0 : vector<4x1x8x128xf32> to vector<32x128xf32>
    %c0_3 = arith.constant 0 : index
    %c0_4 = arith.constant 0 : index
    %c0_5 = arith.constant 0 : index
    %c0_6 = arith.constant 0 : index
    %2 = vector.load %arg2[%c0_3, %c0_4, %c0_5, %c0_6] : memref<4x1x8x128xf32, #tpu.memory_space<vmem>>, vector<4x1x8x128xf32>
    %3 = vector.shape_cast %2 : vector<4x1x8x128xf32> to vector<32x128xf32>
    %c0_7 = arith.constant 0 : index
    %c0_8 = arith.constant 0 : index
    %4 = vector.load %arg3[%c0_7, %c0_8] : memref<128x128xf32, #tpu.memory_space<vmem>>, vector<128x128xf32>
    %cst = arith.constant dense<0.000000e+00> : vector<32x128xf32>
    %5 = tpu.matmul %1, %4, %cst {dimension_numbers = #tpu.dot_dimension_numbers<[1], [0], [0], [1], [0, 0, 1, 1], [], []>} : vector<32x128xf32>, vector<128x128xf32>, vector<32x128xf32> -> vector<32x128xf32>
    %c0_9 = arith.constant 0 : index
    %c0_10 = arith.constant 0 : index
    %6 = vector.load %arg4[%c0_9, %c0_10] : memref<128x128xf32, #tpu.memory_space<vmem>>, vector<128x128xf32>
    %cst_11 = arith.constant dense<0.000000e+00> : vector<32x128xf32>
    %7 = tpu.matmul %3, %6, %cst_11 {dimension_numbers = #tpu.dot_dimension_numbers<[1], [0], [0], [1], [0, 0, 1, 1], [], []>} : vector<32x128xf32>, vector<128x128xf32>, vector<32x128xf32> -> vector<32x128xf32>
    %8 = arith.addf %5, %7 : vector<32x128xf32>
    %cst_12 = arith.constant dense<0.000000e+00> : vector<32xf32>
    %9 = vector.multi_reduction <add>, %8, %cst_12 [1] : vector<32x128xf32> to vector<32xf32>
    %10 = vector.shape_cast %9 : vector<32xf32> to vector<32x1xf32>
    %cst_13 = arith.constant 7.812500e-03 : f32
    %11 = vector.broadcast %cst_13 : f32 to vector<32x1xf32>
    %12 = arith.mulf %10, %11 : vector<32x1xf32>
    %13 = arith.mulf %8, %8 : vector<32x128xf32>
    %cst_14 = arith.constant dense<0.000000e+00> : vector<32xf32>
    %14 = vector.multi_reduction <add>, %13, %cst_14 [1] : vector<32x128xf32> to vector<32xf32>
    %15 = vector.shape_cast %14 : vector<32xf32> to vector<32x1xf32>
    %cst_15 = arith.constant 7.812500e-03 : f32
    %16 = vector.broadcast %cst_15 : f32 to vector<32x1xf32>
    %17 = arith.mulf %15, %16 : vector<32x1xf32>
    %18 = arith.mulf %12, %12 : vector<32x1xf32>
    %19 = arith.subf %17, %18 : vector<32x1xf32>
    %cst_16 = arith.constant 0.000000e+00 : f32
    %20 = vector.broadcast %cst_16 : f32 to vector<32x1xf32>
    %21 = arith.maximumf %19, %20 : vector<32x1xf32>
    %22 = vector.broadcast %12 : vector<32x1xf32> to vector<32x128xf32>
    %23 = arith.subf %8, %22 : vector<32x128xf32>
    %cst_17 = arith.constant 9.99999974E-6 : f32
    %24 = vector.broadcast %cst_17 : f32 to vector<32x1xf32>
    %25 = arith.addf %21, %24 : vector<32x1xf32>
    %26 = math.rsqrt %25 : vector<32x1xf32>
    %27 = vector.broadcast %26 : vector<32x1xf32> to vector<32x128xf32>
    %28 = arith.mulf %23, %27 : vector<32x128xf32>
    %c0_18 = arith.constant 0 : index
    %c0_19 = arith.constant 0 : index
    %29 = vector.load %arg5[%c0_18, %c0_19] : memref<1x128xf32, #tpu.memory_space<vmem>>, vector<1x128xf32>
    %30 = vector.broadcast %29 : vector<1x128xf32> to vector<32x128xf32>
    %31 = arith.mulf %28, %30 : vector<32x128xf32>
    %c0_20 = arith.constant 0 : index
    %c0_21 = arith.constant 0 : index
    %32 = vector.load %arg6[%c0_20, %c0_21] : memref<1x128xf32, #tpu.memory_space<vmem>>, vector<1x128xf32>
    %33 = vector.broadcast %32 : vector<1x128xf32> to vector<32x128xf32>
    %34 = arith.addf %31, %33 : vector<32x128xf32>
    %c0_22 = arith.constant 0 : index
    %c0_23 = arith.constant 0 : index
    %35 = vector.load %arg7[%c0_22, %c0_23] : memref<32x128xf32, #tpu.memory_space<vmem>>, vector<32x128xf32>
    tpu.vector_store %arg7[%c0_22, %c0_23], %34 {strides = array<i32>} : memref<32x128xf32, #tpu.memory_space<vmem>>, vector<32x128xf32>,
    return
  }
  func.func @transform_0(%arg0: i32) -> (i32, i32, i32, i32) {
    %c0_i32 = arith.constant 0 : i32
    %c0_i32_0 = arith.constant 0 : i32
    %c0_i32_1 = arith.constant 0 : i32
    %c0_i32_2 = arith.constant 0 : i32
    return %arg0, %c0_i32, %c0_i32_0, %c0_i32_1 : i32, i32, i32, i32
  }
  func.func @transform_1(%arg0: i32) -> (i32, i32, i32, i32) {
    %c1_i32 = arith.constant 1 : i32
    %c0_i32 = arith.constant 0 : i32
    %c0_i32_0 = arith.constant 0 : i32
    %c0_i32_1 = arith.constant 0 : i32
    return %arg0, %c1_i32, %c0_i32, %c0_i32_0 : i32, i32, i32, i32
  }
  func.func @transform_2(%arg0: i32) -> (i32, i32) {
    %c0_i32 = arith.constant 0 : i32
    %c0_i32_0 = arith.constant 0 : i32
    %c0_i32_1 = arith.constant 0 : i32
    return %c0_i32, %c0_i32_0 : i32, i32
  }
  func.func @transform_3(%arg0: i32) -> (i32, i32) {
    %c0_i32 = arith.constant 0 : i32
    %c0_i32_0 = arith.constant 0 : i32
    %c0_i32_1 = arith.constant 0 : i32
    return %c0_i32, %c0_i32_0 : i32, i32
  }
  func.func @transform_4(%arg0: i32) -> (i32, i32) {
    %c0_i32 = arith.constant 0 : i32
    %c0_i32_0 = arith.constant 0 : i32
    %c0_i32_1 = arith.constant 0 : i32
    return %c0_i32, %c0_i32_0 : i32, i32
  }
  func.func @transform_5(%arg0: i32) -> (i32, i32) {
    %c0_i32 = arith.constant 0 : i32
    %c0_i32_0 = arith.constant 0 : i32
    %c0_i32_1 = arith.constant 0 : i32
    return %c0_i32, %c0_i32_0 : i32, i32
  }
  func.func @transform_6(%arg0: i32) -> (i32, i32) {
    %c0_i32 = arith.constant 0 : i32
    %c0_i32_0 = arith.constant 0 : i32
    return %arg0, %c0_i32 : i32, i32
  }
}

</mosaic_0001>

<bundles_post_ra>
// kernel: _patch_merging_impl.1
= control target key start
LH: loop header
LB: loop body
LE: loop exit
PB: predicated region body
PF: predicated region fallthrough
CT: control target
= control target key end

     0   :  { %11 = vsyncpa [#allocation5], 0  ;;  %s1149_s0 = inlined_call_operand.vmem [shape: f32[16,2,8,128], index: 0, kind: input, shape index: {}, may-alias: {0,1}]   ;;  %s1150_s1 = inlined_call_operand.vmem [shape: f32[16,2,8,128], index: 1, kind: input, shape index: {}, may-alias: {0,1}]   ;;  %s1151_s2 = inlined_call_operand.vmem [shape: f32[128,128], index: 2, kind: input, shape index: {}]   ;;  %s1152_s3 = inlined_call_operand.vmem [shape: f32[128,128], index: 3, kind: input, shape index: {}]   ;;  %s1153_s4 = inlined_call_operand.vmem [shape: f32[1,128], index: 4, kind: input, shape index: {}]   ;;  %s1154_s5 = inlined_call_operand.vmem [shape: f32[1,128], index: 5, kind: input, shape index: {}]   ;;  %s1155_s6 = inlined_call_operand.hbm [shape: f32[128,128], index: 6, kind: output, shape index: {}]  }
   0x1   :  { %13 = vsyncpa [#allocation5 + $0x1], 0  ;;  %s897_s21 = smov 0   ;;  %s899_s22 = smov 0  }
   0x2   :  { %s901_s23 = smov 0   ;;  %s903_s24 = smov 0  }
   0x3 LB: > { %s685_s25 = sadd.s32 4294967295, %s858_s24   ;;  %s686_s26 = sadd.s32 4294967294, %s858_s24   ;;  %s858_s24 = sphi %s903_s24, %s1162_s24   ;;  %s854_s23 = sphi %s901_s23, %s1161_s23   ;;  %s850_s22 = sphi %s899_s22, %s1160_s22   ;;  %s846_s21 = sphi %s897_s21, %s1159_s21  }
   0x4   : > { %s920_s27 = sadd.s32 1, %s858_s24   ;;  %s26_s28 = sadd.s32 1, %s854_s23 }
   0x5   : > { %s23_s29 = ssub.s32 %s858_s24, %s920_s27  ;;  %p33_p0 = scmp.ne.s32.totalorder %s854_s23, %s850_s22 }
   0x6   : > { %p24_p1 = scmp.eq.s32.totalorder %s23_s29, 0  ;;  %p34_p2 = scmp.eq.s32.totalorder %s858_s24, 0 }
   0x7   : > { %p173_p3 = scmp.eq.s32.totalorder %s685_s25, 3  ;;  %p178_p4 = scmp.ne.s32.totalorder %s850_s22, %s846_s21 }
   0x8   : > { %s933_s30 = scalar_select %p24_p1, %s854_s23, %s26_s28  }
   0x9   : > { %p935_p5 = por %p34_p2, %p33_p0  ;;  %p939_p6 = por %p173_p3, %p33_p0 }
   0xa   : > { %p179_p7 = scmp.eq.s32.totalorder %s686_s26, 3  ;;  %p688_p9 = scmp.ge.s32.totalorder %s858_s24, 4 }
   0xc   : > { %p943_p8 = por %p179_p7, %p178_p4  ;;  %207 = sbr.rel (%p688_p9) target bundleno = 33 (0x21), region = 32 }
  0x11   : > { %210 = sbr.rel (!%p935_p5) target bundleno = 25 (0x19), region = 36  ;;  %s212_s10 = sand.u32 (%p935_p5), 1, %s854_s23  }
  0x12   : > { %s710_s11 = sshll.u32 (%p935_p5), %s858_s24, 6  ;;  %s689_s12 = sshll.u32 (%p935_p5), %s212_s10, 5 }
  0x13   : > { %s218_s15 = scalar_lea.vmem (%p935_p5), %s1149_s0, %s710_s11  ;;  %s214_s16 = scalar_lea.vmem (%p935_p5), [#allocation2], %s689_s12 }
  0x14   : > { %v253_v0 = vld [vmem:[%s218_s15] sm:$0xff] (%p935_p5)  ;;  %v255_v1 = vld [vmem:[%s218_s15 + $0x10] sm:$0xff] (%p935_p5) }
  0x15   : > { %v257_v2 = vld [vmem:[%s218_s15 + $0x20] sm:$0xff] (%p935_p5)  ;;  %254 = vst [vmem:[%s214_s16] sm:$0xff] (%p935_p5), %v253_v0  ;;  %v259_v3 = vld [vmem:[%s218_s15 + $0x30] sm:$0xff] (%p935_p5) }
  0x16   : > { %256 = vst [vmem:[%s214_s16 + $0x8] sm:$0xff] %v255_v1 }
  0x17   : > { %258 = vst [vmem:[%s214_s16 + $0x10] sm:$0xff] %v257_v2 }
  0x18   : > { %260 = vst [vmem:[%s214_s16 + $0x18] sm:$0xff] %v259_v3 }
  0x19 PF: > { %266 = sbr.rel (!%p935_p5) target bundleno = 33 (0x21), region = 74  ;;  %s268_s17 = sand.u32 (%p935_p5), 1, %s854_s23  }
  0x1a   : > { %s711_s18 = sshll.u32 (%p935_p5), %s858_s24, 6  ;;  %s693_s19 = sshll.u32 (%p935_p5), %s268_s17, 5 }
  0x1b   : > { %s630_s28 = scalar_lea.vmem (%p935_p5), %s1150_s1, %s711_s18  ;;  %s270_s29 = scalar_lea.vmem (%p935_p5), [#allocation3], %s693_s19 }
  0x1c   : > { %v696_v4 = vld [vmem:[%s630_s28 + $0x8] sm:$0xff] (%p935_p5)  ;;  %v697_v5 = vld [vmem:[%s630_s28 + $0x18] sm:$0xff] (%p935_p5) }
  0x1d   : > { %v698_v6 = vld [vmem:[%s630_s28 + $0x28] sm:$0xff] (%p935_p5)  ;;  %311 = vst [vmem:[%s270_s29] sm:$0xff] (%p935_p5), %v696_v4  ;;  %v699_v7 = vld [vmem:[%s630_s28 + $0x38] sm:$0xff] (%p935_p5) }
  0x1e   : > { %313 = vst [vmem:[%s270_s29 + $0x8] sm:$0xff] %v697_v5 }
  0x1f   : > { %315 = vst [vmem:[%s270_s29 + $0x10] sm:$0xff] %v698_v6 }
  0x20   : > { %317 = vst [vmem:[%s270_s29 + $0x18] sm:$0xff] %v699_v7 }
  0x21 PF: > { %p700_p10 = scmp.ge.s32.totalorder %s858_s24, 1  ;;  %p322_p11 = scmp.lt.s32.totalorder %s858_s24, 5 }
  0x23   : > { %p323_p12 = pnand %p700_p10, %p322_p11 }
  0x24   : > { %s329_s12 = sand.u32 (!%p323_p12), 1, %s850_s22   ;;  %s816_s20 = scalar_lea.hbm (!%p323_p12), %s1155_s6, 128 }
  0x25   : > { %326 = sbr.rel (%p323_p12) target bundleno = 378 (0x17a), region = 112  ;;  %s1048_s19 = sshll.u32 (!%p323_p12), %s329_s12, 5 }
  0x26   : > { %s338_s16 = scalar_lea.vmem (!%p323_p12), [#allocation3], %s1048_s19  ;;  %s331_s17 = scalar_lea.vmem (!%p323_p12), [#allocation2], %s1048_s19 }
  0x27   : > { %s1103_s29 = scalar_lea.vmem (!%p323_p12), [#allocation4], %s1048_s19  ;;  %s712_s19 = sshll.u32 (!%p323_p12), %s685_s25, 5 }
  0x28   : > { %s594_s11 = scalar_lea.hbm (!%p323_p12), %s1155_s6, %s712_s19  ;;  %s595_s13 = sshll.u32 (!%p323_p12), %s1103_s29, 4  ;;  %s596_s13 = int_to_ptr.vmem [resolvable:$true] %s595_s13 }
  0x29   : > { %s597_s25 = sshll.u32 (!%p323_p12), %s594_s11, 4  ;;  %s583_s14 = scalar_lea.sflag (!%p323_p12), [#allocation5], %s329_s12  ;;  %s598_s25 = int_to_ptr.hbm [resolvable:$true] %s597_s25 }
  0x2a   : > { %v411_v8 = vld [vmem:[%s1152_s3 + $0x78] sm:$0xff]  ;;  %v410_v10 = vld [vmem:[%s1152_s3 + $0x70] sm:$0xff]  ;;  %v409_v12 = vld [vmem:[%s1152_s3 + $0x68] sm:$0xff]  ;;  %s810_s15 = sshra.s32 %s598_s25, 4  ;;  %s811_s15 = int_to_ptr.hbm [resolvable:$true] %s810_s15 }
  0x2b   : > { %v395_v9 = vld [vmem:[%s1151_s2 + $0x78] sm:$0xff]  ;;  %412 = vmatpush.msra.mxu0 %v411_v8  ;;  %713 = vmatpush.msra.mxu2 %v411_v8  ;;  %v394_v11 = vld [vmem:[%s1151_s2 + $0x70] sm:$0xff]  ;;  %v393_v13 = vld [vmem:[%s1151_s2 + $0x68] sm:$0xff]  ;;  %p817_p2 = scmp.lt.s32.totalorder %s811_s15, %s1155_s6 }
  0x2c   : > { %441 = vmatpush.msra.mxu1 %v395_v9  ;;  %729 = vmatpush.msra.mxu3 %v395_v9  ;;  %v408_v14 = vld [vmem:[%s1152_s3 + $0x60] sm:$0xff]  ;;  %v407_v16 = vld [vmem:[%s1152_s3 + $0x58] sm:$0xff]  ;;  %v406_v18 = vld [vmem:[%s1152_s3 + $0x50] sm:$0xff] }
  0x2d   : > { %413 = vmatpush.msra.mxu0 %v410_v10  ;;  %714 = vmatpush.msra.mxu2 %v410_v10  ;;  %v392_v15 = vld [vmem:[%s1151_s2 + $0x60] sm:$0xff]  ;;  %v391_v17 = vld [vmem:[%s1151_s2 + $0x58] sm:$0xff]  ;;  %v390_v19 = vld [vmem:[%s1151_s2 + $0x50] sm:$0xff] }
  0x2e   : > { %442 = vmatpush.msra.mxu1 %v394_v11  ;;  %730 = vmatpush.msra.mxu3 %v394_v11  ;;  %v405_v20 = vld [vmem:[%s1152_s3 + $0x48] sm:$0xff]  ;;  %v404_v22 = vld [vmem:[%s1152_s3 + $0x40] sm:$0xff]  ;;  %v403_v24 = vld [vmem:[%s1152_s3 + $0x38] sm:$0xff] }
  0x2f   : > { %414 = vmatpush.msra.mxu0 %v409_v12  ;;  %715 = vmatpush.msra.mxu2 %v409_v12  ;;  %v389_v21 = vld [vmem:[%s1151_s2 + $0x48] sm:$0xff]  ;;  %v388_v23 = vld [vmem:[%s1151_s2 + $0x40] sm:$0xff]  ;;  %v387_v25 = vld [vmem:[%s1151_s2 + $0x38] sm:$0xff] }
  0x30   : > { %443 = vmatpush.msra.mxu1 %v393_v13  ;;  %731 = vmatpush.msra.mxu3 %v393_v13  ;;  %v402_v26 = vld [vmem:[%s1152_s3 + $0x30] sm:$0xff]  ;;  %v401_v28 = vld [vmem:[%s1152_s3 + $0x28] sm:$0xff]  ;;  %v400_v30 = vld [vmem:[%s1152_s3 + $0x20] sm:$0xff] }
  0x31   : > { %415 = vmatpush.msra.mxu0 %v408_v14  ;;  %716 = vmatpush.msra.mxu2 %v408_v14  ;;  %v386_v27 = vld [vmem:[%s1151_s2 + $0x30] sm:$0xff]  ;;  %v385_v29 = vld [vmem:[%s1151_s2 + $0x28] sm:$0xff]  ;;  %v384_v31 = vld [vmem:[%s1151_s2 + $0x20] sm:$0xff] }
  0x32   : > { %444 = vmatpush.msra.mxu1 %v392_v15  ;;  %732 = vmatpush.msra.mxu3 %v392_v15  ;;  %v399_v32 = vld [vmem:[%s1152_s3 + $0x18] sm:$0xff]  ;;  %v398_v34 = vld [vmem:[%s1152_s3 + $0x10] sm:$0xff]  ;;  %v397_v36 = vld [vmem:[%s1152_s3 + $0x8] sm:$0xff] }
  0x33   : > { %416 = vmatpush.msra.mxu0 %v407_v16  ;;  %717 = vmatpush.msra.mxu2 %v407_v16  ;;  %v383_v33 = vld [vmem:[%s1151_s2 + $0x18] sm:$0xff]  ;;  %v382_v35 = vld [vmem:[%s1151_s2 + $0x10] sm:$0xff]  ;;  %v381_v37 = vld [vmem:[%s1151_s2 + $0x8] sm:$0xff] }
  0x34   : > { %445 = vmatpush.msra.mxu1 %v391_v17  ;;  %733 = vmatpush.msra.mxu3 %v391_v17  ;;  %v396_v38 = vld [vmem:[%s1152_s3] sm:$0xff]  ;;  %v378_v41 = vld [vmem:[%s338_s16 + $0x10] sm:$0xff]  ;;  %v377_v44 = vld [vmem:[%s338_s16 + $0x8] sm:$0xff] }
  0x35   : > { %417 = vmatpush.msra.mxu0 %v406_v18  ;;  %718 = vmatpush.msra.mxu2 %v406_v18  ;;  %v380_v39 = vld [vmem:[%s1151_s2] sm:$0xff]  ;;  %v374_v43 = vld [vmem:[%s331_s17 + $0x10] sm:$0xff]  ;;  %v379_v45 = vld [vmem:[%s338_s16 + $0x18] sm:$0xff] }
  0x36   : > { %446 = vmatpush.msra.mxu1 %v390_v19  ;;  %734 = vmatpush.msra.mxu3 %v390_v19  ;;  %v376_v40 = vld [vmem:[%s338_s16] sm:$0xff]  ;;  %v373_v46 = vld [vmem:[%s331_s17 + $0x8] sm:$0xff]  ;;  %v375_v47 = vld [vmem:[%s331_s17 + $0x18] sm:$0xff]  ;;  %s812_s16 = scalar_lea.hbm %s811_s15, 32 }
  0x37   : > { %418 = vmatpush.msra.mxu0 %v405_v20  ;;  %719 = vmatpush.msra.mxu2 %v405_v20  ;;  %v372_v42 = vld [vmem:[%s331_s17] sm:$0xff]  ;;  %p813_p13 = scmp.ne.s32.totalorder %s811_s15, %s812_s16  ;;  %p818_p3 = scmp.lt.s32.totalorder %s816_s20, %s812_s16 }
  0x38   : > { %447 = vmatpush.msra.mxu1 %v389_v21  ;;  %735 = vmatpush.msra.mxu3 %v389_v21 }
  0x39   : > { %419 = vmatpush.msra.mxu0 %v404_v22  ;;  %720 = vmatpush.msra.mxu2 %v404_v22  ;;  %p814_p0 = pnand %p813_p13, %p939_p6  ;;  %p819_p4 = por %p818_p3, %p817_p2 }
  0x3a   : > { %448 = vmatpush.msra.mxu1 %v388_v23  ;;  %736 = vmatpush.msra.mxu3 %v388_v23 }
  0x3b   : > { %420 = vmatpush.msra.mxu0 %v403_v24  ;;  %721 = vmatpush.msra.mxu2 %v403_v24  ;;  %p815_p1 = pneg %p814_p0 }
  0x3c   : > { %449 = vmatpush.msra.mxu1 %v387_v25  ;;  %737 = vmatpush.msra.mxu3 %v387_v25 }
  0x3d   : > { %421 = vmatpush.msra.mxu0 %v402_v26  ;;  %722 = vmatpush.msra.mxu2 %v402_v26  ;;  %p820_p5 = pnand %p819_p4, %p815_p1 }
  0x3e   : > { %450 = vmatpush.msra.mxu1 %v386_v27  ;;  %738 = vmatpush.msra.mxu3 %v386_v27 }
  0x3f   : > { %422 = vmatpush.msra.mxu0 %v401_v28  ;;  %723 = vmatpush.msra.mxu2 %v401_v28 }
  0x40   : > { %451 = vmatpush.msra.mxu1 %v385_v29  ;;  %739 = vmatpush.msra.mxu3 %v385_v29 }
  0x41   : > { %423 = vmatpush.msra.mxu0 %v400_v30  ;;  %724 = vmatpush.msra.mxu2 %v400_v30 }
  0x42   : > { %452 = vmatpush.msra.mxu1 %v384_v31  ;;  %740 = vmatpush.msra.mxu3 %v384_v31 }
  0x43   : > { %424 = vmatpush.msra.mxu0 %v399_v32  ;;  %725 = vmatpush.msra.mxu2 %v399_v32 }
  0x44   : > { %453 = vmatpush.msra.mxu1 %v383_v33  ;;  %741 = vmatpush.msra.mxu3 %v383_v33 }
  0x45   : > { %425 = vmatpush.msra.mxu0 %v398_v34  ;;  %726 = vmatpush.msra.mxu2 %v398_v34 }
  0x46   : > { %454 = vmatpush.msra.mxu1 %v382_v35  ;;  %742 = vmatpush.msra.mxu3 %v382_v35 }
  0x47   : > { %426 = vmatpush.msra.mxu0 %v397_v36  ;;  %727 = vmatpush.msra.mxu2 %v397_v36 }
  0x48   : > { %455 = vmatpush.msra.mxu1 %v381_v37  ;;  %743 = vmatpush.msra.mxu3 %v381_v37 }
  0x49   : > { %427 = vmatpush.msra.mxu0 %v396_v38  ;;  %728 = vmatpush.msra.mxu2 %v396_v38  ;;  %v786_v38 = vld [vmem:[%s1153_s4] ss:$0 sm:$0xff] }
  0x4a   : > { %456 = vmatpush.msra.mxu1 %v380_v39  ;;  %744 = vmatpush.msra.mxu3 %v380_v39 }
  0x4b   : > { %428 = vmatmul.f32.vlgmr.msra.gmra.mxu0 %v376_v40  ;;  %434 = vmatmul.f32.vlgmr.msra.gmra.mxu2 %v378_v41 }
  0x4c   : > { %457 = vmatmul.f32.vlgmr.msra.gmra.mxu1 %v372_v42  ;;  %463 = vmatmul.f32.vlgmr.msra.gmra.mxu3 %v374_v43  ;;  %v787_v42 = vld [vmem:[%s1154_s5] ss:$0 sm:$0xff] }
  0x53   : > { %431 = vmatmul.f32.gmra.mxu0 %v377_v44  ;;  %437 = vmatmul.f32.gmra.mxu2 %v379_v45 }
  0x54   : > { %460 = vmatmul.f32.gmra.mxu1 %v373_v46  ;;  %466 = vmatmul.f32.gmra.mxu3 %v375_v47 }
  0xc8   : > { %v429_v48 = vpop.f32.mrf.mxu0 }
  0xc9   : > { %v458_v49 = vpop.f32.mrf.mxu1 }
  0xca   : > { %v1067_v50 = vadd.f32 %v458_v49, %v429_v48 }
  0xcc   : > { %470 = vadd.xlane.f32.xlu0 %v1067_v50  ;;  %v482_v51 = vmul.f32 %v1067_v50, %v1067_v50 }
  0xce   : > { %486 = vadd.xlane.f32.xlu2 %v482_v51  ;;  %v435_v52 = vpop.f32.mrf.mxu2 }
  0xcf   : > { %v464_v53 = vpop.f32.mrf.mxu3 }
  0xd0   : > { %v1072_v54 = vadd.f32 %v464_v53, %v435_v52  ;;  %v432_v55 = vpop.f32.mrf.mxu0 }
  0xd1   : > { %v461_v56 = vpop.f32.mrf.mxu1 }
  0xd2   : > { %v1074_v57 = vadd.f32 %v461_v56, %v432_v55  ;;  %474 = vadd.xlane.f32.xlu1 %v1072_v54  ;;  %v484_v62 = vmul.f32 %v1072_v54, %v1072_v54 }
  0xd4   : > { %472 = vadd.xlane.f32.xlu0 %v1074_v57  ;;  %v483_v58 = vmul.f32 %v1074_v57, %v1074_v57 }
  0xd6   : > { %488 = vadd.xlane.f32.xlu2 %v483_v58  ;;  %v438_v59 = vpop.f32.mrf.mxu2 }
  0xd7   : > { %v467_v60 = vpop.f32.mrf.mxu3 }
  0xd8   : > { %v1080_v61 = vadd.f32 %v467_v60, %v438_v59 }
  0xda   : > { %476 = vadd.xlane.f32.xlu1 %v1080_v61  ;;  %v485_v63 = vmul.f32 %v1080_v61, %v1080_v61 }
  0xdc   : > { %490 = vadd.xlane.f32.xlu0 %v484_v62 }
  0xe2   : > { %492 = vadd.xlane.f32.xlu1 %v485_v63 }
 0x13f   : > { %v471_v0 = vpop.xlane.xlu0 %470 }
 0x140   : > { %v478_v1 = vmul.f32 0.0078125, %v471_v0 }
 0x141   : > { %v487_v2 = vpop.xlane.xlu2 %486 }
 0x142   : > { %v498_v3 = vmul.f32 %v478_v1, %v478_v1  ;;  %v494_v4 = vmul.f32 0.0078125, %v487_v2  ;;  %v510_v37 = vsub.f32 %v1067_v50, %v478_v1 }
 0x144   : > { %v502_v5 = vsub.f32 %v494_v4, %v498_v3 }
 0x145   : > { %v475_v6 = vpop.xlane.xlu1 %474 }
 0x146   : > { %v506_v7 = vmax.f32 %v502_v5, 0.0  ;;  %v1087_v14 = vmul.f32 0.0078125, %v475_v6 }
 0x147   : > { %v473_v8 = vpop.xlane.xlu0 %472 }
 0x148   : > { %v514_v9 = vadd.f32 1e-05, %v506_v7  ;;  %v479_v10 = vmul.f32 0.0078125, %v473_v8  ;;  %v500_v20 = vmul.f32 %v1087_v14, %v1087_v14  ;;  %v512_v3 = vsub.f32 %v1072_v54, %v1087_v14 }
 0x149   : > { %v489_v11 = vpop.xlane.xlu2 %488 }
 0x14a   : > { %788 = vrsqrt.f32 %v514_v9  ;;  %v499_v12 = vmul.f32 %v479_v10, %v479_v10  ;;  %v495_v13 = vmul.f32 0.0078125, %v489_v11  ;;  %vm524_vm0 = vweird.f32 %v514_v9 }
 0x14b   : > { %v511_v55 = vsub.f32 %v1074_v57, %v479_v10 }
 0x14c   : > { %v503_v15 = vsub.f32 %v495_v13, %v499_v12 }
 0x14d   : > { %v477_v16 = vpop.xlane.xlu1 %476 }
 0x14e   : > { %v507_v17 = vmax.f32 %v503_v15, 0.0  ;;  %v1091_v24 = vmul.f32 0.0078125, %v477_v16 }
 0x14f   : > { %v491_v18 = vpop.xlane.xlu0 %490 }
 0x150   : > { %v789_v19 = vpop.eup %788  ;;  %v496_v21 = vmul.f32 0.0078125, %v491_v18  ;;  %v515_v23 = vadd.f32 1e-05, %v507_v17  ;;  %v501_v30 = vmul.f32 %v1091_v24, %v1091_v24  ;;  %v513_v54 = vsub.f32 %v1080_v61, %v1091_v24 }
 0x151   : > { %v519_v22 = vmul.f32 %v789_v19, %v514_v9  ;;  %vm525_vm1 = vweird.f32 %v789_v19 }
 0x152   : > { %v504_v25 = vsub.f32 %v496_v21, %v500_v20  ;;  %790 = vrsqrt.f32 %v515_v23  ;;  %vm526_vm2 = vmor %vm524_vm0, %vm525_vm1  ;;  %vm534_vm3 = vweird.f32 %v515_v23 }
 0x153   : > { %v520_v26 = vmul.f32 %v789_v19, %v519_v22 }
 0x154   : > { %v508_v27 = vmax.f32 %v504_v25, 0.0 }
 0x155   : > { %v521_v28 = vmul.f32 0.5, %v520_v26  ;;  %v493_v29 = vpop.xlane.xlu1 %492 }
 0x156   : > { %v516_v31 = vadd.f32 1e-05, %v508_v27  ;;  %v497_v32 = vmul.f32 0.0078125, %v493_v29 }
 0x157   : > { %v522_v33 = vsub.f32 1.5, %v521_v28 }
 0x158   : > { %792 = vrsqrt.f32 %v516_v31  ;;  %v505_v34 = vsub.f32 %v497_v32, %v501_v30  ;;  %v791_v35 = vpop.eup %790  ;;  %vm544_vm7 = vweird.f32 %v516_v31 }
 0x159   : > { %v523_v36 = vmul.f32 %v789_v19, %v522_v33  ;;  %v529_v39 = vmul.f32 %v791_v35, %v515_v23  ;;  %vm535_vm4 = vweird.f32 %v791_v35 }
 0x15a   : > { %v509_v40 = vmax.f32 %v505_v34, 0.0  ;;  %vm536_vm5 = vmor %vm534_vm3, %vm535_vm4 }
 0x15b   : > { %v527_v41 = vsel %vm526_vm2, %v789_v19, %v523_v36  ;;  %v530_v44 = vmul.f32 %v791_v35, %v529_v39 }
 0x15c   : > { %v558_v43 = vmul.f32 %v527_v41, %v510_v37  ;;  %v517_v45 = vadd.f32 1e-05, %v509_v40 }
 0x15d   : > { %v531_v48 = vmul.f32 0.5, %v530_v44 }
 0x15e   : > { %v793_v46 = vpop.eup %792  ;;  %v566_v47 = vmul.f32 %v786_v38, %v558_v43  ;;  %794 = vrsqrt.f32 %v517_v45  ;;  %vm554_vm10 = vweird.f32 %v517_v45 }
 0x15f   : > { %v539_v49 = vmul.f32 %v793_v46, %v516_v31  ;;  %v532_v51 = vsub.f32 1.5, %v531_v48  ;;  %vm545_vm6 = vweird.f32 %v793_v46 }
 0x160   : > { %v574_v50 = vadd.f32 %v787_v42, %v566_v47  ;;  %vm546_vm8 = vmor %vm544_vm7, %vm545_vm6 }
 0x161   : > { %v540_v52 = vmul.f32 %v793_v46, %v539_v49  ;;  %v533_v53 = vmul.f32 %v791_v35, %v532_v51 }
 0x162   : > { %578 = vst [vmem:[%s1103_s29] sm:$0xff] %v574_v50 }
 0x163   : > { %v541_v56 = vmul.f32 0.5, %v540_v52  ;;  %v537_v59 = vsel %vm536_vm5, %v791_v35, %v533_v53 }
 0x164   : > { %v795_v58 = vpop.eup %794  ;;  %v559_v60 = vmul.f32 %v537_v59, %v511_v55 }
 0x165   : > { %v542_v62 = vsub.f32 1.5, %v541_v56  ;;  %v549_v63 = vmul.f32 %v795_v58, %v517_v45  ;;  %vm555_vm9 = vweird.f32 %v795_v58 }
 0x166   : > { %v567_v0 = vmul.f32 %v786_v38, %v559_v60  ;;  %vm556_vm11 = vmor %vm554_vm10, %vm555_vm9 }
 0x167   : > { %v543_v1 = vmul.f32 %v793_v46, %v542_v62  ;;  %v550_v2 = vmul.f32 %v795_v58, %v549_v63 }
 0x168   : > { %v575_v4 = vadd.f32 %v787_v42, %v567_v0 }
 0x169   : > { %v547_v57 = vsel %vm546_vm8, %v793_v46, %v543_v1  ;;  %v551_v5 = vmul.f32 0.5, %v550_v2 }
 0x16a   : > { %v560_v6 = vmul.f32 %v547_v57, %v512_v3  ;;  %579 = vst [vmem:[%s1103_s29 + $0x8] sm:$0xff] %v575_v4 }
 0x16b   : > { %v552_v7 = vsub.f32 1.5, %v551_v5 }
 0x16c   : > { %v568_v8 = vmul.f32 %v786_v38, %v560_v6 }
 0x16d   : > { %v553_v9 = vmul.f32 %v795_v58, %v552_v7 }
 0x16e   : > { %v576_v10 = vadd.f32 %v787_v42, %v568_v8 }
 0x16f   : > { %v557_v11 = vsel %vm556_vm11, %v795_v58, %v553_v9 }
 0x170   : > { %580 = vst [vmem:[%s1103_s29 + $0x10] sm:$0xff] %v576_v10  ;;  %v561_v12 = vmul.f32 %v557_v11, %v513_v54 }
 0x172   : > { %v569_v13 = vmul.f32 %v786_v38, %v561_v12 }
 0x174   : > { %v577_v14 = vadd.f32 %v787_v42, %v569_v13 }
 0x176   : > { %581 = vst [vmem:[%s1103_s29 + $0x18] sm:$0xff] %v577_v14 }
 0x177   : > { %823 = shalt.err (!%p820_p5)
}
 0x178   : > { %s860_s12 = smov 128   ;;  %s861_s29 = smov 8  }
 0x179   : > { %745 = dma.vmem_to_hbm [thread:$0]  (%p939_p6), %s596_s13, 512, %s598_s25, %s583_s14, %s860_s12, %s860_s12, %s861_s29  }
 0x17a PF: > { %p751_p7 = scmp.ge.s32.totalorder %s858_s24, 2  ;;  %s612_s19 = sand.u32 1, %s846_s21  }
 0x17b   : > { %s613_s7 = scalar_lea.sflag [#allocation5], %s612_s19 }
 0x17c   : > { %p748_p9 = pnand %p751_p7, %p943_p8 }
 0x17e   : > { %p749_p10 = pneg %p748_p9 }
 0x180   : > { %841 = dma.done.wait (%p749_p10), %s613_s7, 512  }
 0x181   : > { %843 = vsyncadd (%p749_p10), %s613_s7, 4294966784  ;;  %p16_p11 = scmp.ge.s32.totalorder %s920_s27, 6   ;;  %s1159_s21 = smov %s850_s22 }
 0x182   : > { %s1160_s22 = smov %s854_s23  ;;  %s1161_s23 = smov %s933_s30 }
 0x183   : > { %s1162_s24 = smov %s920_s27  ;;  %18 = sbr.rel (!%p16_p11) target bundleno = 3 (0x3), region = 168 }
 0x188   :  { %619 = vsyncpa [#allocation5], 1 }
 0x189   :  { %621 = vsyncpa [#allocation5 + $0x1], 1 }

</bundles_post_ra>
